<compile_context>
chip_gen: v7x
topology: tpu7x:2x2x1
jax: 0.10.0
libtpu: 0.0.40
codegen_flags: <defaults>
</compile_context>

<pallas_src>
import functools

import jax
import jax.numpy as jnp
from jax import lax
from jax.experimental import pallas as pl
from jax.experimental.pallas import tpu as pltpu


def _round_up(n, m):
    return ((n + m - 1) // m) * m


def _pack_params(arrays):
    """Pack small 2-D f32 arrays into one [R, C] slab; each block starts at an 8-aligned row.

    Returns (slab, layout) with layout[name] = (row_start, rows, cols) (Python ints)."""
    cols = max(int(a.shape[1]) for a in arrays.values())
    layout, blocks, row = {}, [], 0
    for name, a in arrays.items():
        a = jnp.asarray(a, jnp.float32)
        r, c = int(a.shape[0]), int(a.shape[1])
        r_pad = _round_up(r, 8)
        blocks.append(jnp.pad(a, ((0, r_pad - r), (0, cols - c))))
        layout[name] = (row, r, c)
        row += r_pad
    return jnp.concatenate(blocks, axis=0), layout


def _graph_model_kernel(K, df, H1, H2, layout,
                        x_ref, p_ref, idx_col_ref, dst_row_ref,
                        desc_ref, gk_ref):
    f32 = jnp.float32
    N = x_ref.shape[0]
    E = idx_col_ref.shape[0]

    def P(name):                                   # static view into the packed param slab
        r0, r, c = layout[name]
        return p_ref[r0:r0 + r, 0:c]

    # ---- node features (k-invariant, hoisted) ----
    h0 = jnp.dot(x_ref[...], P("wh"), preferred_element_type=f32)          # [N, df]
    xw1 = jnp.dot(h0, P("wg1"), preferred_element_type=f32)                # [N, H1]

    # ---- 0/1 selectors built in-kernel from int32 edge indices ----
    src_col = idx_col_ref[:, 0:1]                                          # [E, 1] int32
    dst_col = idx_col_ref[:, 1:2]                                          # [E, 1] int32
    lane_iota = lax.broadcasted_iota(jnp.int32, (E, N), 1)
    ssrc = jnp.where(lane_iota == src_col, 1.0, 0.0)                       # [E, N] gather @ src
    sdst = jnp.where(lane_iota == dst_col, 1.0, 0.0)                       # [E, N] gather @ dst
    sel_gather = jnp.concatenate([ssrc, sdst], axis=0)                     # [2E, N] fused gather selector
    sub_iota = lax.broadcasted_iota(jnp.int32, (N, E), 0)
    sdst_t = jnp.where(sub_iota == dst_row_ref[...], 1.0, 0.0)             # [N, E] scatter-add @ dst

    # ---- fused gather #1: (h0 || xw1) at src and dst in ONE matmul ----
    payload1 = jnp.concatenate([h0, xw1], axis=1)                          # [N, df+H1]
    g1 = jnp.dot(sel_gather, payload1, preferred_element_type=f32)         # [2E, df+H1]
    h_src = g1[:E, :df]
    h_dst = g1[E:, :df]
    xw1_src = g1[:E, df:df + H1]                                           # [E, H1]

    # ---- all-K per-edge MLPs: sigmoid(w2 . relu(W1 [h_src|h_dst] + b1) + b2) ----
    edge_h = jnp.concatenate([h_src, h_dst], axis=1)                       # [E, 2df]
    hid = jnp.maximum(jnp.dot(edge_h, P("w1"), preferred_element_type=f32)
                      + P("b1"), 0.0)                                      # [E, 2K] = [unit-a | unit-b]
    logits = hid[:, :K] * P("w2a") + hid[:, K:2 * K] * P("w2b") + P("b2")  # [E, K]  (pure VPU)
    gk = jax.nn.sigmoid(logits)                                            # [E, K]  edge weights
    gk_ref[...] = gk                                                       # single full store
    # TODO(synk): for large E emit lane-dense [K, E] here instead of [E, K].

    # ---- symmetric GCN normalization, batched over all K (self-loop weight 1) ----
    deg = jnp.dot(sdst_t, gk, preferred_element_type=f32) + 1.0            # [N, K], >= 1
    d_inv = lax.rsqrt(deg)                                                 # [N, K]  D^{-1/2}
    g2 = jnp.dot(sel_gather, d_inv, preferred_element_type=f32)            # [2E, K] fused gather #2
    coef = gk * g2[:E, :] * g2[E:, :]                                      # [E, K] per-edge norm weight
    dsq = d_inv * d_inv                                                    # [N, K] self-loop norm weight

    # ---- GCN layer 1, all heads: ONE scatter matmul over a [E, K*H1] message slab ----
    msg1 = jnp.concatenate([coef[:, k:k + 1] * xw1_src for k in range(K)], axis=1)
    m1 = jnp.dot(sdst_t, msg1, preferred_element_type=f32)                 # [N, K*H1]
    self1 = jnp.concatenate([dsq[:, k:k + 1] * xw1 for k in range(K)], axis=1)
    z1 = jnp.maximum(m1 + self1 + P("bg1"), 0.0)                           # [N, K*H1]

    # ---- GCN layer 2, all heads: shared weight applied as host-packed block-diagonal ----
    xw2 = jnp.dot(z1, P("wg2bd"), preferred_element_type=f32)              # [N, K*H2]
    xw2_src = jnp.dot(ssrc, xw2, preferred_element_type=f32)               # [E, K*H2]
    msg2 = jnp.concatenate(
        [coef[:, k:k + 1] * xw2_src[:, k * H2:(k + 1) * H2] for k in range(K)], axis=1)
    m2 = jnp.dot(sdst_t, msg2, preferred_element_type=f32)                 # [N, K*H2]
    self2 = jnp.concatenate(
        [dsq[:, k:k + 1] * xw2[:, k * H2:(k + 1) * H2] for k in range(K)], axis=1)
    z2 = jnp.maximum(m2 + self2 + P("bg2"), 0.0)                           # [N, K*H2]

    # ---- mean pool over nodes (all heads at once) + one batched fc, single store ----
    pooled = jnp.mean(z2, axis=0, keepdims=True)                           # [1, K*H2]
    pooled_k = jnp.concatenate(
        [pooled[:, k * H2:(k + 1) * H2] for k in range(K)], axis=0)        # [K, H2] (registers, no scratch)
    desc_ref[...] = (jnp.dot(pooled_k, P("wfc"), preferred_element_type=f32)
                     + P("bfc"))                                           # [K, out_dim]


def graph_model_forward(X, params, edge_index, K):
    """Returns (descriptors [K, out_dim], Gk_list: list of K arrays of shape [E])."""
    f32 = jnp.float32
    E = int(edge_index.shape[1])
    df = int(params["wh"].shape[1])
    H1 = int(params["wg1"].shape[1])
    H2 = int(params["wg2"].shape[1])
    out_dim = int(params["wfc"].shape[1])

    # --- host-side repack of all weights/biases into ONE VMEM slab (tiny, once per call) ---
    w1_full = jnp.concatenate([params["w1"][:, :, 0].T,
                               params["w1"][:, :, 1].T], axis=1)            # [2df, 2K] = [unit-a | unit-b]
    b1_row = jnp.concatenate([params["b1"][:, 0, 0].reshape(1, K),
                              params["b1"][:, 0, 1].reshape(1, K)], axis=1)  # [1, 2K]
    w2a = params["w2t"][:, 0, 0].reshape(1, K)                               # [1, K]
    w2b = params["w2t"][:, 0, 1].reshape(1, K)                               # [1, K]
    b2_row = params["b2"][:, 0, 0].reshape(1, K)                             # [1, K]
    wg2_bd = jnp.kron(jnp.eye(K, dtype=f32), params["wg2"].astype(f32))      # [K*H1, K*H2] block-diag
    bg1_rep = jnp.tile(params["bg1"].astype(f32), (1, K))                    # [1, K*H1]
    bg2_rep = jnp.tile(params["bg2"].astype(f32), (1, K))                    # [1, K*H2]

    slab, layout = _pack_params(dict(
        wh=params["wh"], w1=w1_full, b1=b1_row, w2a=w2a, w2b=w2b, b2=b2_row,
        wg1=params["wg1"], bg1=bg1_rep, wg2bd=wg2_bd, bg2=bg2_rep,
        wfc=params["wfc"], bfc=params["bfc"]))

    idx_col = jnp.stack([edge_index[0], edge_index[1]], axis=1).astype(jnp.int32)  # [E, 2]
    dst_row = edge_index[1].astype(jnp.int32).reshape(1, E)                        # [1, E]

    vmem = pl.BlockSpec(memory_space=pltpu.MemorySpace.VMEM)
    kernel = functools.partial(_graph_model_kernel, K, df, H1, H2, layout)

    desc, gk_all = pl.pallas_call(
        kernel,
        out_shape=(jax.ShapeDtypeStruct((K, out_dim), f32),
                   jax.ShapeDtypeStruct((E, K), f32)),
        in_specs=[vmem] * 4,                       # 4 input DMAs total (was 16)
        out_specs=(vmem, vmem),
    )(X.astype(f32), slab, idx_col, dst_row)

    gk_list = [gk_all[:, k] for k in range(K)]     # matches Gk_list ([E] each, detached)
    return desc, gk_list


if __name__ == "__main__":
    # small shapes implied by the module
    N = 8                      # number of graph nodes
    input_dim = 16             # X feature dim
    df = 8                     # Wh output dim
    input_dim_h = df           # autoencoder input dim (h_0 has df features)
    hidden_dim1 = 16
    hidden_dim2 = 16
    out_dim = 32
    K = 3

    # deterministic edge list (no self loops), E = 16
    src = jnp.concatenate([jnp.arange(N), jnp.arange(N)])
    dst = jnp.concatenate([(jnp.arange(N) + 1) % N, (jnp.arange(N) + 3) % N])
    edge_index = jnp.stack([src, dst]).astype(jnp.int32)             # [2, 16]

    key = jax.random.PRNGKey(0)
    ks = jax.random.split(key, 8)

    def xavier(k, shape):
        fan_in, fan_out = shape[-2], shape[-1]
        std = (2.0 / (fan_in + fan_out)) ** 0.5
        return (std * jax.random.normal(k, shape)).astype(jnp.float32)

    params = dict(
        wh=xavier(ks[0], (input_dim, df)),                           # self.Wh
        # MLPLayers(2*df, hidden=2, K): Linear(2df,2) -> ReLU -> Linear(2,1), biases = 0
        w1=xavier(ks[1], (K, 2 * df, 2)),
        b1=jnp.zeros((K, 1, 2), jnp.float32),
        w2t=xavier(ks[2], (K, 1, 2)),                                # Linear(2,1) weight, stored transposed
        b2=jnp.zeros((K, 1, 1), jnp.float32),
        # GraphAutoEncoder: GCNConv(df,H1), GCNConv(H1,H2), Linear(H2,out_dim)
        wg1=xavier(ks[3], (input_dim_h, hidden_dim1)),
        bg1=jnp.zeros((1, hidden_dim1), jnp.float32),
        wg2=xavier(ks[4], (hidden_dim1, hidden_dim2)),
        bg2=jnp.zeros((1, hidden_dim2), jnp.float32),
        wfc=xavier(ks[5], (hidden_dim2, out_dim)),
        bfc=jnp.zeros((1, out_dim), jnp.float32),
    )

    X = jax.random.normal(ks[6], (N, input_dim), dtype=jnp.float32)

    descriptors, gk_list = graph_model_forward(X, params, edge_index, K)
    descriptors = jax.block_until_ready(descriptors)
    gk_list = [jax.block_until_ready(g) for g in gk_list]

    assert descriptors.shape == (K, out_dim)
    assert len(gk_list) == K and all(g.shape == (edge_index.shape[1],) for g in gk_list)
    assert bool(jnp.all(jnp.isfinite(descriptors)))
    assert all(bool(jnp.all((g > 0.0) & (g < 1.0))) for g in gk_list)
    print("KERNEL_OK")
</pallas_src>

<mosaic_0001>
module attributes {stable_mosaic.version = 11 : i64} {
  func.func @_graph_model_kernel(%arg0: memref<8x16xf32, #tpu.memory_space<vmem>>, %arg1: memref<160x48xf32, #tpu.memory_space<vmem>>, %arg2: memref<16x2xi32, #tpu.memory_space<vmem>>, %arg3: memref<1x16xi32, #tpu.memory_space<vmem>>, %arg4: memref<3x32xf32, #tpu.memory_space<vmem>>, %arg5: memref<16x3xf32, #tpu.memory_space<vmem>>) attributes {dimension_semantics = [], scalar_prefetch = 0 : i64, scratch_operands = 0 : i64, tpu.core_type = #tpu.core_type<tc>} {
    %c0 = arith.constant 0 : index
    %c0_0 = arith.constant 0 : index
    %0 = vector.load %arg0[%c0, %c0_0] : memref<8x16xf32, #tpu.memory_space<vmem>>, vector<8x16xf32>
    %c0_1 = arith.constant 0 : index
    %c0_2 = arith.constant 0 : index
    %1 = vector.load %arg1[%c0_1, %c0_2] : memref<160x48xf32, #tpu.memory_space<vmem>>, vector<16x8xf32>
    %cst = arith.constant dense<0.000000e+00> : vector<8x8xf32>
    %2 = tpu.matmul %0, %1, %cst {dimension_numbers = #tpu.dot_dimension_numbers<[1], [0], [0], [1], [0, 0, 1, 1], [], []>} : vector<8x16xf32>, vector<16x8xf32>, vector<8x8xf32> -> vector<8x8xf32>
    %c64 = arith.constant 64 : index
    %c0_3 = arith.constant 0 : index
    %3 = vector.load %arg1[%c64, %c0_3] : memref<160x48xf32, #tpu.memory_space<vmem>>, vector<8x16xf32>
    %cst_4 = arith.constant dense<0.000000e+00> : vector<8x16xf32>
    %4 = tpu.matmul %2, %3, %cst_4 {dimension_numbers = #tpu.dot_dimension_numbers<[1], [0], [0], [1], [0, 0, 1, 1], [], []>} : vector<8x8xf32>, vector<8x16xf32>, vector<8x16xf32> -> vector<8x16xf32>
    %c0_5 = arith.constant 0 : index
    %c0_6 = arith.constant 0 : index
    %5 = vector.load %arg2[%c0_5, %c0_6] : memref<16x2xi32, #tpu.memory_space<vmem>>, vector<16x1xi32>
    %c0_7 = arith.constant 0 : index
    %c1 = arith.constant 1 : index
    %6 = vector.load %arg2[%c0_7, %c1] : memref<16x2xi32, #tpu.memory_space<vmem>>, vector<16x1xi32>
    %7 = tpu.iota {dimensions = array<i32: 1>} : vector<16x8xi32>
    %8 = vector.broadcast %5 : vector<16x1xi32> to vector<16x8xi32>
    %9 = arith.cmpi eq, %7, %8 : vector<16x8xi32>
    %cst_8 = arith.constant 1.000000e+00 : f32
    %cst_9 = arith.constant 0.000000e+00 : f32
    %10 = vector.broadcast %cst_8 : f32 to vector<16x8xf32>
    %11 = vector.broadcast %cst_9 : f32 to vector<16x8xf32>
    %12 = arith.select %9, %10, %11 : vector<16x8xi1>, vector<16x8xf32>
    %13 = vector.broadcast %6 : vector<16x1xi32> to vector<16x8xi32>
    %14 = arith.cmpi eq, %7, %13 : vector<16x8xi32>
    %cst_10 = arith.constant 1.000000e+00 : f32
    %cst_11 = arith.constant 0.000000e+00 : f32
    %15 = vector.broadcast %cst_10 : f32 to vector<16x8xf32>
    %16 = vector.broadcast %cst_11 : f32 to vector<16x8xf32>
    %17 = arith.select %14, %15, %16 : vector<16x8xi1>, vector<16x8xf32>
    %18 = tpu.concatenate %12, %17 in 0 : vector<16x8xf32>, vector<16x8xf32> -> vector<32x8xf32>
    %19 = tpu.iota {dimensions = array<i32: 0>} : vector<8x16xi32>
    %c0_12 = arith.constant 0 : index
    %c0_13 = arith.constant 0 : index
    %20 = vector.load %arg3[%c0_12, %c0_13] : memref<1x16xi32, #tpu.memory_space<vmem>>, vector<1x16xi32>
    %21 = vector.broadcast %20 : vector<1x16xi32> to vector<8x16xi32>
    %22 = arith.cmpi eq, %19, %21 : vector<8x16xi32>
    %cst_14 = arith.constant 1.000000e+00 : f32
    %cst_15 = arith.constant 0.000000e+00 : f32
    %23 = vector.broadcast %cst_14 : f32 to vector<8x16xf32>
    %24 = vector.broadcast %cst_15 : f32 to vector<8x16xf32>
    %25 = arith.select %22, %23, %24 : vector<8x16xi1>, vector<8x16xf32>
    %26 = tpu.concatenate %2, %4 in 1 : vector<8x8xf32>, vector<8x16xf32> -> vector<8x24xf32>
    %cst_16 = arith.constant dense<0.000000e+00> : vector<32x24xf32>
    %27 = tpu.matmul %18, %26, %cst_16 {dimension_numbers = #tpu.dot_dimension_numbers<[1], [0], [0], [1], [0, 0, 1, 1], [], []>} : vector<32x8xf32>, vector<8x24xf32>, vector<32x24xf32> -> vector<32x24xf32>
    %28 = vector.extract_strided_slice %27 {offsets = [0, 0], sizes = [16, 8], strides = [1, 1]} : vector<32x24xf32> to vector<16x8xf32>
    %29 = vector.extract_strided_slice %27 {offsets = [16, 0], sizes = [16, 8], strides = [1, 1]} : vector<32x24xf32> to vector<16x8xf32>
    %30 = vector.extract_strided_slice %27 {offsets = [0, 8], sizes = [16, 16], strides = [1, 1]} : vector<32x24xf32> to vector<16x16xf32>
    %31 = tpu.concatenate %28, %29 in 1 : vector<16x8xf32>, vector<16x8xf32> -> vector<16x16xf32>
    %c16 = arith.constant 16 : index
    %c0_17 = arith.constant 0 : index
    %32 = vector.load %arg1[%c16, %c0_17] : memref<160x48xf32, #tpu.memory_space<vmem>>, vector<16x6xf32>
    %cst_18 = arith.constant dense<0.000000e+00> : vector<16x6xf32>
    %33 = tpu.matmul %31, %32, %cst_18 {dimension_numbers = #tpu.dot_dimension_numbers<[1], [0], [0], [1], [0, 0, 1, 1], [], []>} : vector<16x16xf32>, vector<16x6xf32>, vector<16x6xf32> -> vector<16x6xf32>
    %c32 = arith.constant 32 : index
    %c0_19 = arith.constant 0 : index
    %34 = vector.load %arg1[%c32, %c0_19] : memref<160x48xf32, #tpu.memory_space<vmem>>, vector<1x6xf32>
    %35 = vector.broadcast %34 : vector<1x6xf32> to vector<16x6xf32>
    %36 = arith.addf %33, %35 : vector<16x6xf32>
    %cst_20 = arith.constant 0.000000e+00 : f32
    %37 = vector.broadcast %cst_20 : f32 to vector<16x6xf32>
    %38 = arith.maximumf %36, %37 : vector<16x6xf32>
    %39 = vector.extract_strided_slice %38 {offsets = [0, 0], sizes = [16, 3], strides = [1, 1]} : vector<16x6xf32> to vector<16x3xf32>
    %c40 = arith.constant 40 : index
    %c0_21 = arith.constant 0 : index
    %40 = vector.load %arg1[%c40, %c0_21] : memref<160x48xf32, #tpu.memory_space<vmem>>, vector<1x3xf32>
    %41 = vector.broadcast %40 : vector<1x3xf32> to vector<16x3xf32>
    %42 = arith.mulf %39, %41 : vector<16x3xf32>
    %43 = vector.extract_strided_slice %38 {offsets = [0, 3], sizes = [16, 3], strides = [1, 1]} : vector<16x6xf32> to vector<16x3xf32>
    %c48 = arith.constant 48 : index
    %c0_22 = arith.constant 0 : index
    %44 = vector.load %arg1[%c48, %c0_22] : memref<160x48xf32, #tpu.memory_space<vmem>>, vector<1x3xf32>
    %45 = vector.broadcast %44 : vector<1x3xf32> to vector<16x3xf32>
    %46 = arith.mulf %43, %45 : vector<16x3xf32>
    %47 = arith.addf %42, %46 : vector<16x3xf32>
    %c56 = arith.constant 56 : index
    %c0_23 = arith.constant 0 : index
    %48 = vector.load %arg1[%c56, %c0_23] : memref<160x48xf32, #tpu.memory_space<vmem>>, vector<1x3xf32>
    %49 = vector.broadcast %48 : vector<1x3xf32> to vector<16x3xf32>
    %50 = arith.addf %47, %49 : vector<16x3xf32>
    %51 = arith.negf %50 : vector<16x3xf32>
    %52 = math.exp %51 : vector<16x3xf32>
    %cst_24 = arith.constant 1.000000e+00 : f32
    %53 = vector.broadcast %cst_24 : f32 to vector<16x3xf32>
    %54 = arith.addf %53, %52 : vector<16x3xf32>
    %55 = arith.divf %53, %54 : vector<16x3xf32>
    %c0_25 = arith.constant 0 : index
    %c0_26 = arith.constant 0 : index
    %56 = vector.load %arg5[%c0_25, %c0_26] : memref<16x3xf32, #tpu.memory_space<vmem>>, vector<16x3xf32>
    tpu.vector_store %arg5[%c0_25, %c0_26], %55 {strides = array<i32>} : memref<16x3xf32, #tpu.memory_space<vmem>>, vector<16x3xf32>,
    %cst_27 = arith.constant dense<0.000000e+00> : vector<8x3xf32>
    %57 = tpu.matmul %25, %55, %cst_27 {dimension_numbers = #tpu.dot_dimension_numbers<[1], [0], [0], [1], [0, 0, 1, 1], [], []>} : vector<8x16xf32>, vector<16x3xf32>, vector<8x3xf32> -> vector<8x3xf32>
    %cst_28 = arith.constant 1.000000e+00 : f32
    %58 = vector.broadcast %cst_28 : f32 to vector<8x3xf32>
    %59 = arith.addf %57, %58 : vector<8x3xf32>
    %60 = math.rsqrt %59 : vector<8x3xf32>
    %cst_29 = arith.constant dense<0.000000e+00> : vector<32x3xf32>
    %61 = tpu.matmul %18, %60, %cst_29 {dimension_numbers = #tpu.dot_dimension_numbers<[1], [0], [0], [1], [0, 0, 1, 1], [], []>} : vector<32x8xf32>, vector<8x3xf32>, vector<32x3xf32> -> vector<32x3xf32>
    %62 = vector.extract_strided_slice %61 {offsets = [0, 0], sizes = [16, 3], strides = [1, 1]} : vector<32x3xf32> to vector<16x3xf32>
    %63 = arith.mulf %55, %62 : vector<16x3xf32>
    %64 = vector.extract_strided_slice %61 {offsets = [16, 0], sizes = [16, 3], strides = [1, 1]} : vector<32x3xf32> to vector<16x3xf32>
    %65 = arith.mulf %63, %64 : vector<16x3xf32>
    %66 = arith.mulf %60, %60 : vector<8x3xf32>
    %67 = vector.extract_strided_slice %65 {offsets = [0, 0], sizes = [16, 1], strides = [1, 1]} : vector<16x3xf32> to vector<16x1xf32>
    %68 = vector.broadcast %67 : vector<16x1xf32> to vector<16x16xf32>
    %69 = arith.mulf %68, %30 : vector<16x16xf32>
    %70 = vector.extract_strided_slice %65 {offsets = [0, 1], sizes = [16, 1], strides = [1, 1]} : vector<16x3xf32> to vector<16x1xf32>
    %71 = vector.broadcast %70 : vector<16x1xf32> to vector<16x16xf32>
    %72 = arith.mulf %71, %30 : vector<16x16xf32>
    %73 = vector.extract_strided_slice %65 {offsets = [0, 2], sizes = [16, 1], strides = [1, 1]} : vector<16x3xf32> to vector<16x1xf32>
    %74 = vector.broadcast %73 : vector<16x1xf32> to vector<16x16xf32>
    %75 = arith.mulf %74, %30 : vector<16x16xf32>
    %76 = tpu.concatenate %69, %72, %75 in 1 : vector<16x16xf32>, vector<16x16xf32>, vector<16x16xf32> -> vector<16x48xf32>
    %cst_30 = arith.constant dense<0.000000e+00> : vector<8x48xf32>
    %77 = tpu.matmul %25, %76, %cst_30 {dimension_numbers = #tpu.dot_dimension_numbers<[1], [0], [0], [1], [0, 0, 1, 1], [], []>} : vector<8x16xf32>, vector<16x48xf32>, vector<8x48xf32> -> vector<8x48xf32>
    %78 = vector.extract_strided_slice %66 {offsets = [0, 0], sizes = [8, 1], strides = [1, 1]} : vector<8x3xf32> to vector<8x1xf32>
    %79 = vector.broadcast %78 : vector<8x1xf32> to vector<8x16xf32>
    %80 = arith.mulf %79, %4 : vector<8x16xf32>
    %81 = vector.extract_strided_slice %66 {offsets = [0, 1], sizes = [8, 1], strides = [1, 1]} : vector<8x3xf32> to vector<8x1xf32>
    %82 = vector.broadcast %81 : vector<8x1xf32> to vector<8x16xf32>
    %83 = arith.mulf %82, %4 : vector<8x16xf32>
    %84 = vector.extract_strided_slice %66 {offsets = [0, 2], sizes = [8, 1], strides = [1, 1]} : vector<8x3xf32> to vector<8x1xf32>
    %85 = vector.broadcast %84 : vector<8x1xf32> to vector<8x16xf32>
    %86 = arith.mulf %85, %4 : vector<8x16xf32>
    %87 = tpu.concatenate %80, %83, %86 in 1 : vector<8x16xf32>, vector<8x16xf32>, vector<8x16xf32> -> vector<8x48xf32>
    %88 = arith.addf %77, %87 : vector<8x48xf32>
    %c72 = arith.constant 72 : index
    %c0_31 = arith.constant 0 : index
    %89 = vector.load %arg1[%c72, %c0_31] : memref<160x48xf32, #tpu.memory_space<vmem>>, vector<1x48xf32>
    %90 = vector.broadcast %89 : vector<1x48xf32> to vector<8x48xf32>
    %91 = arith.addf %88, %90 : vector<8x48xf32>
    %cst_32 = arith.constant 0.000000e+00 : f32
    %92 = vector.broadcast %cst_32 : f32 to vector<8x48xf32>
    %93 = arith.maximumf %91, %92 : vector<8x48xf32>
    %c80 = arith.constant 80 : index
    %c0_33 = arith.constant 0 : index
    %94 = vector.load %arg1[%c80, %c0_33] : memref<160x48xf32, #tpu.memory_space<vmem>>, vector<48x48xf32>
    %cst_34 = arith.constant dense<0.000000e+00> : vector<8x48xf32>
    %95 = tpu.matmul %93, %94, %cst_34 {dimension_numbers = #tpu.dot_dimension_numbers<[1], [0], [0], [1], [0, 0, 1, 1], [], []>} : vector<8x48xf32>, vector<48x48xf32>, vector<8x48xf32> -> vector<8x48xf32>
    %cst_35 = arith.constant dense<0.000000e+00> : vector<16x48xf32>
    %96 = tpu.matmul %12, %95, %cst_35 {dimension_numbers = #tpu.dot_dimension_numbers<[1], [0], [0], [1], [0, 0, 1, 1], [], []>} : vector<16x8xf32>, vector<8x48xf32>, vector<16x48xf32> -> vector<16x48xf32>
    %97 = vector.extract_strided_slice %65 {offsets = [0, 0], sizes = [16, 1], strides = [1, 1]} : vector<16x3xf32> to vector<16x1xf32>
    %98 = vector.extract_strided_slice %96 {offsets = [0, 0], sizes = [16, 16], strides = [1, 1]} : vector<16x48xf32> to vector<16x16xf32>
    %99 = vector.broadcast %97 : vector<16x1xf32> to vector<16x16xf32>
    %100 = arith.mulf %99, %98 : vector<16x16xf32>
    %101 = vector.extract_strided_slice %65 {offsets = [0, 1], sizes = [16, 1], strides = [1, 1]} : vector<16x3xf32> to vector<16x1xf32>
    %102 = vector.extract_strided_slice %96 {offsets = [0, 16], sizes = [16, 16], strides = [1, 1]} : vector<16x48xf32> to vector<16x16xf32>
    %103 = vector.broadcast %101 : vector<16x1xf32> to vector<16x16xf32>
    %104 = arith.mulf %103, %102 : vector<16x16xf32>
    %105 = vector.extract_strided_slice %65 {offsets = [0, 2], sizes = [16, 1], strides = [1, 1]} : vector<16x3xf32> to vector<16x1xf32>
    %106 = vector.extract_strided_slice %96 {offsets = [0, 32], sizes = [16, 16], strides = [1, 1]} : vector<16x48xf32> to vector<16x16xf32>
    %107 = vector.broadcast %105 : vector<16x1xf32> to vector<16x16xf32>
    %108 = arith.mulf %107, %106 : vector<16x16xf32>
    %109 = tpu.concatenate %100, %104, %108 in 1 : vector<16x16xf32>, vector<16x16xf32>, vector<16x16xf32> -> vector<16x48xf32>
    %cst_36 = arith.constant dense<0.000000e+00> : vector<8x48xf32>
    %110 = tpu.matmul %25, %109, %cst_36 {dimension_numbers = #tpu.dot_dimension_numbers<[1], [0], [0], [1], [0, 0, 1, 1], [], []>} : vector<8x16xf32>, vector<16x48xf32>, vector<8x48xf32> -> vector<8x48xf32>
    %111 = vector.extract_strided_slice %66 {offsets = [0, 0], sizes = [8, 1], strides = [1, 1]} : vector<8x3xf32> to vector<8x1xf32>
    %112 = vector.extract_strided_slice %95 {offsets = [0, 0], sizes = [8, 16], strides = [1, 1]} : vector<8x48xf32> to vector<8x16xf32>
    %113 = vector.broadcast %111 : vector<8x1xf32> to vector<8x16xf32>
    %114 = arith.mulf %113, %112 : vector<8x16xf32>
    %115 = vector.extract_strided_slice %66 {offsets = [0, 1], sizes = [8, 1], strides = [1, 1]} : vector<8x3xf32> to vector<8x1xf32>
    %116 = vector.extract_strided_slice %95 {offsets = [0, 16], sizes = [8, 16], strides = [1, 1]} : vector<8x48xf32> to vector<8x16xf32>
    %117 = vector.broadcast %115 : vector<8x1xf32> to vector<8x16xf32>
    %118 = arith.mulf %117, %116 : vector<8x16xf32>
    %119 = vector.extract_strided_slice %66 {offsets = [0, 2], sizes = [8, 1], strides = [1, 1]} : vector<8x3xf32> to vector<8x1xf32>
    %120 = vector.extract_strided_slice %95 {offsets = [0, 32], sizes = [8, 16], strides = [1, 1]} : vector<8x48xf32> to vector<8x16xf32>
    %121 = vector.broadcast %119 : vector<8x1xf32> to vector<8x16xf32>
    %122 = arith.mulf %121, %120 : vector<8x16xf32>
    %123 = tpu.concatenate %114, %118, %122 in 1 : vector<8x16xf32>, vector<8x16xf32>, vector<8x16xf32> -> vector<8x48xf32>
    %124 = arith.addf %110, %123 : vector<8x48xf32>
    %c128 = arith.constant 128 : index
    %c0_37 = arith.constant 0 : index
    %125 = vector.load %arg1[%c128, %c0_37] : memref<160x48xf32, #tpu.memory_space<vmem>>, vector<1x48xf32>
    %126 = vector.broadcast %125 : vector<1x48xf32> to vector<8x48xf32>
    %127 = arith.addf %124, %126 : vector<8x48xf32>
    %cst_38 = arith.constant 0.000000e+00 : f32
    %128 = vector.broadcast %cst_38 : f32 to vector<8x48xf32>
    %129 = arith.maximumf %127, %128 : vector<8x48xf32>
    %cst_39 = arith.constant dense<0.000000e+00> : vector<48xf32>
    %130 = vector.multi_reduction <add>, %129, %cst_39 [0] : vector<8x48xf32> to vector<48xf32>
    %131 = vector.shape_cast %130 : vector<48xf32> to vector<1x48xf32>
    %cst_40 = arith.constant 8.000000e+00 : f32
    %132 = vector.broadcast %cst_40 : f32 to vector<1x48xf32>
    %133 = arith.divf %131, %132 : vector<1x48xf32>
    %134 = vector.extract_strided_slice %133 {offsets = [0, 0], sizes = [1, 16], strides = [1, 1]} : vector<1x48xf32> to vector<1x16xf32>
    %135 = vector.extract_strided_slice %133 {offsets = [0, 16], sizes = [1, 16], strides = [1, 1]} : vector<1x48xf32> to vector<1x16xf32>
    %136 = vector.extract_strided_slice %133 {offsets = [0, 32], sizes = [1, 16], strides = [1, 1]} : vector<1x48xf32> to vector<1x16xf32>
    %137 = tpu.concatenate %134, %135, %136 in 0 : vector<1x16xf32>, vector<1x16xf32>, vector<1x16xf32> -> vector<3x16xf32>
    %c136 = arith.constant 136 : index
    %c0_41 = arith.constant 0 : index
    %138 = vector.load %arg1[%c136, %c0_41] : memref<160x48xf32, #tpu.memory_space<vmem>>, vector<16x32xf32>
    %cst_42 = arith.constant dense<0.000000e+00> : vector<3x32xf32>
    %139 = tpu.matmul %137, %138, %cst_42 {dimension_numbers = #tpu.dot_dimension_numbers<[1], [0], [0], [1], [0, 0, 1, 1], [], []>} : vector<3x16xf32>, vector<16x32xf32>, vector<3x32xf32> -> vector<3x32xf32>
    %c152 = arith.constant 152 : index
    %c0_43 = arith.constant 0 : index
    %140 = vector.load %arg1[%c152, %c0_43] : memref<160x48xf32, #tpu.memory_space<vmem>>, vector<1x32xf32>
    %141 = vector.broadcast %140 : vector<1x32xf32> to vector<3x32xf32>
    %142 = arith.addf %139, %141 : vector<3x32xf32>
    %c0_44 = arith.constant 0 : index
    %c0_45 = arith.constant 0 : index
    %143 = vector.load %arg4[%c0_44, %c0_45] : memref<3x32xf32, #tpu.memory_space<vmem>>, vector<3x32xf32>
    tpu.vector_store %arg4[%c0_44, %c0_45], %142 {strides = array<i32>} : memref<3x32xf32, #tpu.memory_space<vmem>>, vector<3x32xf32>,
    return
  }
}

</mosaic_0001>

<bundles_post_ra>
// kernel: tpu_custom_call.1
= control target key start
LH: loop header
LB: loop body
LE: loop exit
PB: predicated region body
PF: predicated region fallthrough
CT: control target
= control target key end

     0   :  { %v1407_v2 = vmov 0.0|0.0   ;;  %vm1408_vm0 = vmmov 0   ;;  %v1409_v4 = vmov 0.0   ;;  %s1684_s0 = inlined_call_operand.vmem [shape: f32[8,16], index: 0, kind: input, shape index: {}]   ;;  %s1685_s1 = inlined_call_operand.vmem [shape: f32[160,48], index: 1, kind: input, shape index: {}]   ;;  %s1686_s2 = inlined_call_operand.vmem [shape: s32[16,2], index: 2, kind: input, shape index: {}]   ;;  %s1687_s3 = inlined_call_operand.vmem [shape: s32[1,16], index: 3, kind: input, shape index: {}]   ;;  %s1688_s4 = inlined_call_operand.hbm [shape: f32[3,32], index: 4, kind: output, shape index: {0}]   ;;  %s1689_s5 = inlined_call_operand.vmem [shape: f32[16,3], index: 5, kind: output, shape index: {1}]  }
   0x1   :  { %v21_v0 = vld [vmem:[%s1685_s1] sm:$0xff]  ;;  %v22_v1 = vld [vmem:[%s1685_s1 + $0x8] sm:$0xff]  ;;  %1305 = vmatprep.subr.bf16.mxu0 %v1407_v2  ;;  %1226 = vmatprep.mubr.msk.f32.mxu0 %vm1408_vm0, %v1409_v4 }
   0x2   :  { %v1306_v3 = vpack.c.bf16 %v22_v1, %v21_v0 }
   0x3   :  { %11 = vsyncpa [#allocation3], 0  ;;  %1229 = vmatprep.subr.mxu1 %v1409_v4  ;;  %1231 = vmatprep.mubr.msk.f32.mxu1 %vm1408_vm0, %v1409_v4  ;;  %v20_v5 = vld [vmem:[%s1684_s0] sm:$0xff]  ;;  %vm23_vm1 = vcmask 130048   ;;  %v1410_v8 = vmov 0   ;;  %v1411_v9 = vmov 1   ;;  %v174_v13 = vlaneseq }
   0x4   :  { %1307 = vmatpush3.bf16.msra.mxu0 %v1306_v3  ;;  %v97_v6 = vld [vmem:[%s1685_s1 + $0x40] sm:$0xff]  ;;  %1349 = vset.pattern.permute.xlu0 %v1410_v8  ;;  %v173_v10 = vld [vmem:[%s1686_s2 + $0x8] sm:$0xff]  ;;  %vm98_vm2 = vcmask 64512   ;;  %v317_v27 = vld [vmem:[%s1685_s1 + $0x10] sm:$0xff]  ;;  %s1413_s10 = smov 3   ;;  %s1414_s13 = smov 125  }
   0x5   :  { %1230 = vmatpush3.msra.mxu1 %v97_v6  ;;  %v172_v7 = vld [vmem:[%s1686_s2] sm:$0xff]  ;;  %1350 = vset.pattern.permute.xlu1 %v1411_v9  ;;  %v175_v14 = vand.u32 127, %v174_v13  ;;  %s1412_s2 = smov 8   ;;  %v318_v28 = vld [vmem:[%s1685_s1 + $0x18] sm:$0xff]  ;;  %v1163_v34 = vld [vmem:[%s1685_s1 + $0x30] ss:$0 sm:$0xff] }
   0x6   :  { %177 = vperm.xlu0 %1349, %v172_v7   ;;  %187 = vperm.xlu1 %1350, %v172_v7   ;;  %v1308_v29 = vpack.c.bf16 %v318_v28, %v317_v27  ;;  %v1159_v39 = vld [vmem:[%s1685_s1 + $0x20] ss:$0 sm:$0xff]  ;;  %v1162_v49 = vld [vmem:[%s1685_s1 + $0x28] ss:$0 sm:$0xff]  ;;  %v1164_v51 = vld [vmem:[%s1685_s1 + $0x38] ss:$0 sm:$0xff] }
   0x7   :  { %1227 = vmatmul.mubr.msk.f32.vlgmr.msra.gmra.mrb[0].mxu0 %vm23_vm1, %v20_v5  ;;  %v197_v1 = vshrl.u32 %v174_v13, 7  ;;  %vm454_vm7 = vcmask 23552   ;;  %v1154_v3 = vld [vmem:[%s1687_s3] ss:$0 sm:$0xff]  ;;  %s1416_s3 = smov 120   ;;  %vm679_vm9 = vcmask 261120  }
   0x8   :  { %1309 = vmatprep.subr.bf16.mxu0 %v1308_v29  ;;  %s1418_s0 = smov 16   ;;  %s1419_s28 = smov 32   ;;  %vm791_vm10 = vcmask 392192   ;;  %vm1048_vm11 = vcmask 1040384   ;;  %vm1050_vm12 = vcmask 1041408   ;;  %vm1132_vm13 = vcmask 256000  }
   0x9   :  { %1311 = vmatpush3.bf16.msra.mxu0 %v1308_v29  ;;  %vm203_vm8 = vcmp.eq.s32.totalorder %v197_v1, %v1154_v3  ;;  %v790_v1 = vld [vmem:[%s1685_s1 + $0x78] sm:$0xff]  ;;  %s1420_s19 = smov 96   ;;  %s1421_s20 = smov 112  }
   0xa   :  { %180 = vperm.xlu0 %1349, %v173_v10   ;;  %190 = vperm.xlu1 %1350, %v173_v10   ;;  %v1554_v10 = vsel %vm203_vm8, 1.0, %v1409_v4  ;;  %s1422_s23 = smov [#allocation2]  }
   0xb   :  { %1312 = vmatprep.subr.bf16.mxu0 %v1407_v2 }
   0xe   :  { %1351 = vset.pattern.permute.xlu1 %v1410_v8 }
  0x85   :  { %v178_v15 = vpop.permute.xlu0 %177  ;;  %v188_v19 = vpop.permute.xlu1 %187 }
  0x86   :  { %vm182_vm3 = vcmp.eq.s32.totalorder %v175_v14, %v178_v15  ;;  %vm192_vm4 = vcmp.eq.s32.totalorder %v175_v14, %v188_v19 }
  0x87   :  { %v1484_v16 = vsel %vm182_vm3, 1.0, %v1409_v4  ;;  %v1494_v24 = vsel %vm192_vm4, 1.0, %v1409_v4 }
  0x89   :  { %v181_v20 = vpop.permute.xlu0 %180  ;;  %v191_v22 = vpop.permute.xlu1 %190 }
  0x8a   :  { %vm183_vm5 = vcmp.eq.s32.totalorder %v175_v14, %v181_v20  ;;  %vm193_vm6 = vcmp.eq.s32.totalorder %v175_v14, %v191_v22 }
  0x8b   :  { %v1497_v25 = vsel %vm183_vm5, 1.0, %v1409_v4  ;;  %v1504_v26 = vsel %vm193_vm6, 1.0, %v1409_v4 }
  0xda   :  { %v93_v11 = vpop.f32.mrb[0].mxu0 }
  0xdb   :  { %v1228_v12 = vpop.f32.mrb[1].mxu0  ;;  %1232 = vmatmul.mubr.msk.f32.vlgmr.msra.gmra.mrb[0].mxu1 %vm98_vm2, %v93_v11 }
  0xdc   :  { %1236 = vmatprep.mubr.msk.f32.mxu1 %vm98_vm2, %v1484_v16 }
 0x1ae   :  { %v1488_v17 = vpop.f32.mrb[0].mxu1 }
 0x1af   :  { %206 = vrot.lane.b32.xlu0 %v1488_v17, %s1412_s2  ;;  %v1233_v18 = vpop.f32.mrb[1].mxu1 }
 0x221   :  { %v207_v21 = vpop.permute.xlu0 %206 }
 0x222   :  { %v209_v23 = vsel %vm98_vm2, %v93_v11, %v207_v21 }
 0x223   :  { %1234 = vmatprep.subr.mxu1 %v209_v23 }
 0x224   :  { %1235 = vmatpush3.msra.mxu1 %v209_v23 }
 0x225   :  { %1237 = vmatmul.mubr.msk.f32.vlgmr.msra.gmra.mrb[2].mxu1 %vm98_vm2, %v1497_v25 }
 0x226   :  { %1239 = vmatprep.mubr.msk.f32.mxu1 %vm98_vm2, %v1494_v24 }
 0x229   :  { %1240 = vmatmul.mubr.msk.f32.gmra.mrb[4].mxu1 %vm98_vm2, %v1504_v26 }
 0x22a   :  { %1258 = vmatprep.mubr.msk.f32.mxu1 %vm98_vm2, %v1484_v16 }
 0x2f8   :  { %v1517_v30 = vpop.f32.mrb[2].mxu1 }
 0x2f9   :  { %v1519_v31 = vpop.f32.mrb[3].mxu1 }
 0x2fc   :  { %v1241_v32 = vpop.f32.mrb[4].mxu1 }
 0x2fd   :  { %311 = vrot.lane.b32.xlu0 %v1241_v32, %s1412_s2  ;;  %v298_v33 = vpop.f32.mrb[5].mxu1 }
 0x2fe   :  { %309 = vrot.lane.b32.xlu1 %v298_v33, %s1412_s2 }
 0x302   :  { %420 = vrot.lane.b32.xlu1 %v1163_v34, %s1413_s10 }
 0x36f   :  { %v312_v35 = vpop.permute.xlu0 %311 }
 0x370   :  { %v310_v36 = vpop.permute.xlu1 %309  ;;  %v316_v38 = vsel %vm98_vm2, %v1517_v30, %v312_v35 }
 0x371   :  { %v315_v37 = vsel %vm98_vm2, %v1519_v31, %v310_v36 }
 0x372   :  { %1246 = vmatprep.mubr.msk.f32.mxu0 %vm23_vm1, %v315_v37 }
 0x373   :  { %1247 = vmatmul.mubr.msk.f32.vlgmr.msra.gmra.mrb[2].mxu0 %vm23_vm1, %v316_v38 }
 0x374   :  { %1253 = vmatprep.mubr.msk.f32.mxu0 %vm1408_vm0, %v1409_v4  ;;  %v421_v44 = vpop.permute.xlu1 %420 }
 0x446   :  { %v1248_v40 = vpop.f32.mrb[2].mxu0 }
 0x447   :  { %v402_v41 = vadd.f32 %v1248_v40, %v1159_v39  ;;  %v396_v42 = vpop.f32.mrb[3].mxu0 }
 0x448   :  { %v397_v43 = vadd.f32 %v1159_v39, %v396_v42 }
 0x449   :  { %v406_v45 = vmax.f32 %v402_v41, 0.0 }
 0x44a   :  { %v405_v46 = vmax.f32 %v397_v43, 0.0 }
 0x44b   :  { %v424_v47 = vmul.f32 %v421_v44, %v406_v45  ;;  %v413_v50 = vmul.f32 %v1162_v49, %v406_v45 }
 0x44c   :  { %v423_v48 = vmul.f32 %v421_v44, %v405_v46  ;;  %v412_v53 = vmul.f32 %v1162_v49, %v405_v46 }
 0x44d   :  { %429 = vrot.lane.b32.xlu1 %v424_v47, %s1414_s13 }
 0x44e   :  { %427 = vrot.lane.b32.xlu0 %v423_v48, %s1414_s13 }
 0x4bf   :  { %v430_v52 = vpop.permute.xlu1 %429 }
 0x4c0   :  { %v434_v54 = vadd.f32 %v430_v52, %v413_v50  ;;  %v428_v55 = vpop.permute.xlu0 %427 }
 0x4c1   :  { %v433_v56 = vadd.f32 %v428_v55, %v412_v53  ;;  %v785_v55 = vld [vmem:[%s1685_s1 + $0x50] sm:$0xff] }
 0x4c2   :  { %v441_v57 = vadd.f32 %v1164_v51, %v434_v54 }
 0x4c3   :  { %v440_v58 = vadd.f32 %v1164_v51, %v433_v56  ;;  %v786_v56 = vld [vmem:[%s1685_s1 + $0x58] sm:$0xff] }
 0x4c4   :  { %v1166_v59 = vmul.f32 -1.442695, %v441_v57  ;;  %v1319_v57 = vpack.c.bf16 %v786_v56, %v785_v55 }
 0x4c5   :  { %v1165_v60 = vmul.f32 -1.442695, %v440_v58 }
 0x4c6   :  { %1373 = vpow2.f32 %v1166_v59 }
 0x4c7   :  { %1375 = vpow2.f32 %v1165_v60 }
 0x4d0   :  { %v1374_v61 = vpop.eup %1373 }
 0x4d1   :  { %v1376_v62 = vpop.eup %1375  ;;  %v449_v63 = vadd.f32 1.0, %v1374_v61 }
 0x4d2   :  { %v448_v0 = vadd.f32 1.0, %v1376_v62  ;;  %v787_v62 = vld [vmem:[%s1685_s1 + $0x60] sm:$0xff] }
 0x4d3   :  { %1377 = vrcp.f32 %v449_v63 }
 0x4d4   :  { %1379 = vrcp.f32 %v448_v0  ;;  %v789_v0 = vld [vmem:[%s1685_s1 + $0x70] sm:$0xff] }
 0x4d5   :  { %v1325_v3 = vpack.c.bf16 %v790_v1, %v789_v0 }
 0x4dd   :  { %v1378_v5 = vpop.eup %1377 }
 0x4de   :  { %v1380_v6 = vpop.eup %1379  ;;  %456 = vst.msk [vmem:[%s1689_s5 + $0x8] sm:$0xff] %vm454_vm7, %v1378_v5 }
 0x4df   :  { %455 = vst.msk [vmem:[%s1689_s5] sm:$0xff] %vm454_vm7, %v1380_v6  ;;  %v1313_v7 = vpack.c.bf16 %v1378_v5, %v1380_v6  ;;  %s1417_s5 = smov 24  }
 0x4e1   :  { %1314 = vmatpush3.bf16.msra.mxu0 %v1313_v7 }
 0x4e2   :  { %1315 = vmatprep.subr.bf16.mxu0 %v1407_v2 }
 0x4e4   :  { %1254 = vmatmul.mubr.msk.f32.vlgmr.msra.gmra.mrb[4].mxu0 %vm23_vm1, %v1554_v10 }
 0x4e5   :  { %1268 = vmatprep.mubr.msk.f32.mxu0 %vm1408_vm0, %v1409_v4 }
 0x5b7   :  { %v526_v11 = vpop.f32.mrb[4].mxu0 }
 0x5b8   :  { %v527_v12 = vadd.f32 1.0, %v526_v11  ;;  %v1255_v13 = vpop.f32.mrb[5].mxu0 }
 0x5ba   :  { %1381 = vrsqrt.f32 %v527_v12 }
 0x5c4   :  { %v1382_v14 = vpop.eup %1381 }
 0x5c5   :  { %1256 = vmatprep.subr.mxu1 %v1382_v14  ;;  %v620_v42 = vmul.f32 %v1382_v14, %v1382_v14 }
 0x5c6   :  { %1257 = vmatpush3.msra.mxu1 %v1382_v14 }
 0x5c7   :  { %1259 = vmatmul.mubr.msk.f32.vlgmr.msra.gmra.mrb[6].mxu1 %vm98_vm2, %v1497_v25  ;;  %1318 = vmatprep.subr.bf16.mxu1 %v1407_v2 }
 0x5c8   :  { %1261 = vmatprep.mubr.msk.f32.mxu1 %vm98_vm2, %v1494_v24  ;;  %v1415_v24 = vmov 2   ;;  %1320 = vmatpush3.bf16.msra.mxu1 %v1319_v57  ;;  %v1179_v57 = vld [vmem:[%s1685_s1 + $0x98] ss:$0 sm:$0xff] }
 0x5c9   :  { %1321 = vmatprep.subr.bf16.mxu1 %v1407_v2 }
 0x5cb   :  { %1262 = vmatmul.mubr.msk.f32.gmra.mrb[8].mxu1 %vm98_vm2, %v1504_v26 }
 0x5cc   :  { %1283 = vmatprep.mubr.msk.f32.mxu1 %vm1408_vm0, %v1409_v4 }
 0x69a   :  { %v1260_v15 = vpop.f32.mrb[6].mxu1 }
 0x69b   :  { %v597_v18 = vpop.f32.mrb[7].mxu1  ;;  %v617_v19 = vmul.f32 %v1378_v5, %v1260_v15  ;;  %v1173_v15 = vld [vmem:[%s1685_s1 + $0x48] ss:$0 sm:$0xff] }
 0x69c   :  { %v616_v20 = vmul.f32 %v1380_v6, %v597_v18 }
 0x69e   :  { %v1263_v21 = vpop.f32.mrb[8].mxu1 }
 0x69f   :  { %v619_v22 = vmul.f32 %v1263_v21, %v617_v19  ;;  %v607_v23 = vpop.f32.mrb[9].mxu1 }
 0x6a0   :  { %v618_v27 = vmul.f32 %v616_v20, %v607_v23 }
 0x6a1   :  { %628 = vperm.xlu1 %1351, %v619_v22  }
 0x6a2   :  { %623 = vperm.xlu0 %1349, %v618_v27  }
 0x6a5   :  { %1352 = vset.pattern.permute.xlu1 %v1411_v9 }
 0x6a6   :  { %638 = vperm.xlu1 %1352, %v619_v22   ;;  %1353 = vset.pattern.permute.xlu0 %v1411_v9 }
 0x6a7   :  { %634 = vperm.xlu0 %1353, %v618_v27  }
 0x6aa   :  { %1354 = vset.pattern.permute.xlu1 %v1415_v24 }
 0x6ab   :  { %644 = vperm.xlu1 %1354, %v618_v27   ;;  %1355 = vset.pattern.permute.xlu0 %v1415_v24 }
 0x6ac   :  { %648 = vperm.xlu0 %1355, %v619_v22  }
 0x6af   :  { %1371 = vset.pattern.permute.xlu1 %v1411_v9 }
 0x720   :  { %v1573_v26 = vpop.permute.xlu1 %628 }
 0x721   :  { %v632_v28 = vmul.f32 %v1517_v30, %v1573_v26  ;;  %v1577_v29 = vpop.permute.xlu0 %623 }
 0x722   :  { %v631_v32 = vmul.f32 %v1577_v29, %v1519_v31 }
 0x724   :  { %v1356_v33 = vpack.i.bf16 %v632_v28, %v631_v32 }
 0x725   :  { %v1581_v34 = vpop.permute.xlu1 %638 }
 0x726   :  { %v642_v35 = vmul.f32 %v1517_v30, %v1581_v34  ;;  %1357 = vrot.lane.b32.xlu1 %v1356_v33, %s1416_s3  ;;  %v1585_v36 = vpop.permute.xlu0 %634  ;;  %s1140_s3 = sshll.u32 %s1422_s23, 4  ;;  %s1141_s3 = int_to_ptr.vmem [resolvable:$true] %s1140_s3 }
 0x727   :  { %v641_v9 = vmul.f32 %v1585_v36, %v1519_v31  ;;  %p1388_p1 = scmp.lt.s32.totalorder %s1141_s3, %s1141_s3 }
 0x729   :  { %v1361_v37 = vpack.i.bf16 %v642_v35, %v641_v9 }
 0x72a   :  { %v1589_v38 = vpop.permute.xlu1 %644 }
 0x72b   :  { %v651_v39 = vmul.f32 %v1589_v38, %v1519_v31  ;;  %1362 = vrot.lane.b32.xlu1 %v1361_v37, %s1412_s2  ;;  %v1594_v40 = vpop.permute.xlu0 %648 }
 0x72c   :  { %v652_v41 = vmul.f32 %v1517_v30, %v1594_v40 }
 0x72e   :  { %v1366_v43 = vpack.i.bf16 %v652_v41, %v651_v39 }
 0x72f   :  { %689 = vperm.xlu1 %1371, %v620_v42  }
 0x730   :  { %1367 = vrot.lane.b32.xlu0 %v1366_v43, %s1417_s5  ;;  %s1383_s5 = scalar_lea.vmem %s1141_s3, 64 }
 0x731   :  { %p1384_p0 = scmp.ne.s32.totalorder %s1141_s3, %s1383_s5  ;;  %p1389_p2 = scmp.lt.s32.totalorder %s1383_s5, %s1383_s5 }
 0x733   :  { %1372 = vset.pattern.permute.xlu1 %v1410_v8  ;;  %p1390_p3 = por %p1389_p2, %p1388_p1 }
 0x734   :  { %684 = vperm.xlu1 %1372, %v620_v42   ;;  %694 = vperm.xlu0 %1355, %v620_v42  }
 0x735   :  { %p1391_p4 = pnand %p1390_p3, %p1384_p0 }
 0x798   :  { %v1358_v44 = vpop.permute.xlu1 %1357 }
 0x799   :  { %v1360_v47 = vunpack.i.h.bf16 %v1358_v44  ;;  %v1359_v48 = vunpack.i.l.bf16 %v1358_v44 }
 0x79d   :  { %v1363_v45 = vpop.permute.xlu1 %1362 }
 0x79e   :  { %v1365_v46 = vunpack.i.h.bf16 %v1363_v45  ;;  %v1364_v31 = vunpack.i.l.bf16 %v1363_v45 }
 0x7a0   :  { %v678_v30 = vsel %vm23_vm1, %v1360_v47, %v1365_v46  ;;  %v677_v52 = vsel %vm23_vm1, %v1359_v48, %v1364_v31 }
 0x7a2   :  { %v1368_v49 = vpop.permute.xlu0 %1367 }
 0x7a3   :  { %v1370_v50 = vunpack.i.h.bf16 %v1368_v49  ;;  %v1369_v51 = vunpack.i.l.bf16 %v1368_v49 }
 0x7a5   :  { %v681_v53 = vsel %vm679_vm9, %v678_v30, %v1370_v50  ;;  %v680_v8 = vsel %vm679_vm9, %v677_v52, %v1369_v51 }
 0x7a6   :  { %v1316_v54 = vpack.c.bf16 %v681_v53, %v680_v8 }
 0x7a8   :  { %1317 = vmatpush3.bf16.msra.mxu0 %v1316_v54 }
 0x7ab   :  { %1269 = vmatmul.mubr.msk.f32.vlgmr.msra.gmra.mrb[6].mxu0 %vm23_vm1, %v1554_v10 }
 0x7ac   :  { %1288 = vmatprep.mubr.msk.f32.mxu0 %vm98_vm2, %v1484_v16  ;;  %v788_v16 = vld [vmem:[%s1685_s1 + $0x68] sm:$0xff] }
 0x7ad   :  { %v1322_v63 = vpack.c.bf16 %v788_v16, %v787_v62 }
 0x7ae   :  { %v690_v58 = vpop.permute.xlu1 %689 }
 0x7af   :  { %v692_v59 = vmul.f32 %v690_v58, %v1488_v17  ;;  %1323 = vmatpush3.bf16.msra.mxu1 %v1322_v63 }
 0x7b0   :  { %1324 = vmatprep.subr.bf16.mxu1 %v1407_v2 }
 0x7b1   :  { %699 = vrot.lane.b32.xlu0 %v692_v59, %s1418_s0 }
 0x7b3   :  { %v695_v60 = vpop.permute.xlu0 %694  ;;  %1326 = vmatpush3.bf16.msra.mxu1 %v1325_v3  ;;  %v685_v5 = vpop.permute.xlu1 %684 }
 0x7b4   :  { %v697_v61 = vmul.f32 %v695_v60, %v1488_v17  ;;  %v687_v7 = vmul.f32 %v685_v5, %v1488_v17 }
 0x7b6   :  { %703 = vrot.lane.b32.xlu1 %v697_v61, %s1419_s28 }
 0x823   :  { %v700_v6 = vpop.permute.xlu0 %699 }
 0x824   :  { %v706_v12 = vsel %vm23_vm1, %v687_v7, %v700_v6 }
 0x828   :  { %v704_v11 = vpop.permute.xlu1 %703 }
 0x829   :  { %v707_v13 = vsel %vm679_vm9, %v706_v12, %v704_v11 }
 0x87e   :  { %v774_v14 = vpop.f32.mrb[6].mxu0 }
 0x87f   :  { %v775_v18 = vadd.f32 %v774_v14, %v707_v13  ;;  %v1270_v19 = vpop.f32.mrb[7].mxu0 }
 0x881   :  { %v783_v20 = vadd.f32 %v1173_v15, %v775_v18 }
 0x883   :  { %v784_v21 = vmax.f32 %v783_v20, 0.0 }
 0x885   :  { %1284 = vmatmul.mubr.msk.f32.vlgmr.msra.gmra.mrb[10].mxu1 %vm791_vm10, %v784_v21 }
 0x958   :  { %v861_v22 = vpop.f32.mrb[10].mxu1 }
 0x959   :  { %v1285_v23 = vpop.f32.mrb[11].mxu1  ;;  %1286 = vmatprep.subr.mxu0 %v861_v22  ;;  %v952_v42 = vmul.f32 %v861_v22, %v695_v60 }
 0x95a   :  { %1287 = vmatpush3.msra.mxu0 %v861_v22 }
 0x95b   :  { %1289 = vmatmul.mubr.msk.f32.vlgmr.msra.gmra.mrb[8].mxu0 %vm98_vm2, %v1497_v25  ;;  %1327 = vmatprep.subr.bf16.mxu0 %v1407_v2 }
 0x95c   :  { %1295 = vmatprep.mubr.msk.f32.mxu0 %vm1408_vm0, %v1409_v4 }
 0xa2e   :  { %v1290_v17 = vpop.f32.mrb[8].mxu0 }
 0xa2f   :  { %v941_v27 = vmul.f32 %v1290_v17, %v1573_v26  ;;  %v943_v24 = vmul.f32 %v1290_v17, %v1581_v34  ;;  %v945_v28 = vmul.f32 %v1290_v17, %v1594_v40  ;;  %v931_v32 = vpop.f32.mrb[9].mxu0  ;;  %v1053_v34 = vld [vmem:[%s1685_s1 + $0x90] sm:$0xff]  ;;  %v951_v40 = vmul.f32 %v861_v22, %v690_v58 }
 0xa30   :  { %v940_v33 = vmul.f32 %v931_v32, %v1577_v29  ;;  %v942_v35 = vmul.f32 %v931_v32, %v1585_v36  ;;  %v944_v9 = vmul.f32 %v931_v32, %v1589_v38  ;;  %v1052_v29 = vld [vmem:[%s1685_s1 + $0x88] sm:$0xff]  ;;  %v950_v38 = vmul.f32 %v861_v22, %v685_v5 }
 0xa31   :  { %v947_v25 = vsel %vm23_vm1, %v941_v27, %v943_v24  ;;  %v1331_v36 = vpack.c.bf16 %v1053_v34, %v1052_v29 }
 0xa32   :  { %v949_v37 = vsel %vm679_vm9, %v947_v25, %v945_v28  ;;  %v946_v39 = vsel %vm23_vm1, %v940_v33, %v942_v35 }
 0xa33   :  { %v948_v41 = vsel %vm679_vm9, %v946_v39, %v944_v9 }
 0xa34   :  { %v1328_v26 = vpack.c.bf16 %v949_v37, %v948_v41 }
 0xa36   :  { %1329 = vmatpush3.bf16.msra.mxu0 %v1328_v26 }
 0xa37   :  { %1330 = vmatprep.subr.bf16.mxu0 %v1407_v2  ;;  %v953_v2 = vsel %vm23_vm1, %v950_v38, %v951_v40 }
 0xa39   :  { %1296 = vmatmul.mubr.msk.f32.vlgmr.msra.gmra.mrb[10].mxu0 %vm23_vm1, %v1554_v10  ;;  %v954_v10 = vsel %vm679_vm9, %v953_v2, %v952_v42 }
 0xa3a   :  { %1302 = vmatprep.mubr.msk.f32.mxu0 %vm1408_vm0, %v1409_v4  ;;  %1332 = vmatpush3.bf16.msra.mxu0 %v1331_v36  ;;  %v1178_v4 = vld [vmem:[%s1685_s1 + $0x80] ss:$0 sm:$0xff] }
 0xb0c   :  { %v1021_v43 = vpop.f32.mrb[10].mxu0 }
 0xb0d   :  { %v1022_v44 = vadd.f32 %v1021_v43, %v954_v10  ;;  %v1297_v45 = vpop.f32.mrb[11].mxu0 }
 0xb0f   :  { %v1030_v46 = vadd.f32 %v1178_v4, %v1022_v44 }
 0xb11   :  { %v1031_v31 = vmax.f32 %v1030_v46, 0.0 }
 0xb13   :  { %v1032_v47 = vsel %vm791_vm10, %v1031_v31, 0.0 }
 0xb14   :  { %v1033_v48 = vrot.slane %v1032_v47, 4 }
 0xb16   :  { %v1034_v49 = vadd.f32 %v1033_v48, %v1032_v47 }
 0xb18   :  { %v1035_v50 = vrot.slane %v1034_v49, 2 }
 0xb1a   :  { %v1036_v51 = vadd.f32 %v1035_v50, %v1034_v49 }
 0xb1c   :  { %v1037_v30 = vrot.slane %v1036_v51, 1 }
 0xb1e   :  { %v1038_v52 = vadd.f32 %v1037_v30, %v1036_v51 }
 0xb20   :  { %v1040_v53 = vmul.f32 0.125, %v1038_v52 }
 0xb22   :  { %1045 = vrot.lane.b32.xlu1 %v1040_v53, %s1420_s19  ;;  %1042 = vrot.lane.b32.xlu0 %v1040_v53, %s1421_s20 }
 0xb94   :  { %v1046_v8 = vpop.permute.xlu1 %1045  ;;  %v1043_v54 = vpop.permute.xlu0 %1042 }
 0xb95   :  { %v1049_v55 = vsel %vm1048_vm11, %v1040_v53, %v1043_v54 }
 0xb96   :  { %v1051_v56 = vsel %vm1050_vm12, %v1049_v55, %v1046_v8 }
 0xb97   :  { %1303 = vmatmul.mubr.msk.f32.vlgmr.msra.gmra.mrb[12].mxu0 %vm23_vm1, %v1051_v56 }
 0xc6a   :  { %v1128_v58 = vpop.f32.mrb[12].mxu0 }
 0xc6b   :  { %v1129_v59 = vadd.f32 %v1179_v57, %v1128_v58  ;;  %v1304_v60 = vpop.f32.mrb[13].mxu0 }
 0xc6d   :  { %1133 = vst.msk [vmem:[#allocation2] sm:$0x7] %vm1132_vm13, %v1129_v59 }
 0xc6e   :  { %1394 = shalt.err (!%p1391_p4)
}
 0xc6f   :  { %s1395_s26 = scalar_lea.hbm %s1688_s4, 64 }
 0xc70   :  { %p1396_p5 = scmp.ne.s32.totalorder %s1688_s4, %s1395_s26  ;;  %p1399_p6 = scmp.lt.u32.totalorder %s1395_s26, %s1688_s4 }
 0xc72   :  { %p1401_p7 = pnand %p1399_p6, %p1396_p5 }
 0xc74   :  { %1404 = shalt.err (!%p1401_p7)
}
 0xc75   :  { %1143 = dma.vmem_to_hbm [thread:$0]  %s1141_s3, 64, %s1688_s4, [#allocation3]  }
 0xc76   :  { %1405 = dma.done.wait [#allocation3], 64  }
 0xc77   :  { %1406 = vsyncadd [#allocation3], 4294967232 }
 0xc78   :  { %1151 = vsyncpa [#allocation3], 1 }

</bundles_post_ra>
